<compile_context>
chip_gen: v5e
topology: v5e:2x2
jax: 0.10.0
libtpu: 0.0.40
codegen_flags: <defaults>
</compile_context>

<pallas_src>
import functools

import jax
import jax.numpy as jnp
from jax import lax
from jax.experimental import pallas as pl
from jax.experimental.pallas import tpu as pltpu


# ---------------------------------------------------------------------------
# Fused multi-head cross-attention kernel (one batch element per grid step)
# ---------------------------------------------------------------------------

def _mha_fused_kernel(q_ref, kv_ref, wq_ref, bq_ref, wkv_ref, bkv_ref,
                      wo_ref, bo_ref, o_ref, w_ref, *, num_heads):
    D = q_ref.shape[-1]
    dh = D // num_heads
    scale = 1.0 / float(dh) ** 0.5

    q_in = q_ref[...]                     # (Sq, D)
    kv_in = kv_ref[...]                   # (Sk, D)

    # Q projection and packed K/V projection (one matmul, 2D output lanes).
    qp = jnp.dot(q_in, wq_ref[...],
                 preferred_element_type=jnp.float32) + bq_ref[...]
    kvp = jnp.dot(kv_in, wkv_ref[...],
                  preferred_element_type=jnp.float32) + bkv_ref[...]
    k = kvp[:, :D]                        # (Sk, D)
    v = kvp[:, D:]                        # (Sk, D)

    ctx_heads = []
    w_acc = None
    for h in range(num_heads):            # static unroll over heads
        sl = slice(h * dh, (h + 1) * dh)
        qh = qp[:, sl]                     # (Sq, dh)
        kh = k[:, sl]                      # (Sk, dh)
        vh = v[:, sl]                      # (Sk, dh)

        # contract last dims directly: no k.T / no XLU transpose
        s = lax.dot_general(qh, kh, (((1,), (1,)), ((), ())),
                            preferred_element_type=jnp.float32) * scale
        m = jnp.max(s, axis=-1, keepdims=True)
        p = jnp.exp(s - m)
        inv = pl.reciprocal(jnp.sum(p, axis=-1, keepdims=True), approx=True)
        p = p * inv                        # (Sq, Sk) softmax probs

        ctx_heads.append(jnp.dot(p, vh, preferred_element_type=jnp.float32))
        w_acc = p if w_acc is None else w_acc + p

    ctx = jnp.concatenate(ctx_heads, axis=-1)            # (Sq, D)
    o_ref[...] = (jnp.dot(ctx, wo_ref[...],
                          preferred_element_type=jnp.float32) + bo_ref[...])
    # average_attn_weights=True -> mean over heads
    w_ref[...] = w_acc * (1.0 / float(num_heads))


# ---------------------------------------------------------------------------
# Wrapper
# ---------------------------------------------------------------------------

def multihead_cross_attention_map(q, kv, params, num_heads):
    """Returns (attn_output (B,Sq,D), avg_attn_weights (B,Sq,Sk))."""
    B, Sq, D = q.shape
    Sk = kv.shape[1]

    kernel = functools.partial(_mha_fused_kernel, num_heads=num_heads)

    def full2d(shape):
        return pl.BlockSpec(shape, lambda b: (0, 0))

    out, attn_w = pl.pallas_call(
        kernel,
        out_shape=(
            jax.ShapeDtypeStruct((B, Sq, D), jnp.float32),
            jax.ShapeDtypeStruct((B, Sq, Sk), jnp.float32),
        ),
        grid=(B,),
        in_specs=[
            pl.BlockSpec((pl.Squeezed(), Sq, D), lambda b: (b, 0, 0)),   # q
            pl.BlockSpec((pl.Squeezed(), Sk, D), lambda b: (b, 0, 0)),   # kv
            full2d((D, D)),        # wq
            full2d((1, D)),        # bq
            full2d((D, 2 * D)),    # wkv (packed K|V)
            full2d((1, 2 * D)),    # bkv
            full2d((D, D)),        # wo
            full2d((1, D)),        # bo
        ],
        out_specs=(
            pl.BlockSpec((pl.Squeezed(), Sq, D), lambda b: (b, 0, 0)),
            pl.BlockSpec((pl.Squeezed(), Sq, Sk), lambda b: (b, 0, 0)),
        ),
        compiler_params=pltpu.CompilerParams(
            dimension_semantics=("parallel",)),
    )(
        q.astype(jnp.float32), kv.astype(jnp.float32),
        params["wq"], params["bq"],
        params["wkv"], params["bkv"],
        params["wo"], params["bo"],
    )
    return out, attn_w


# ---------------------------------------------------------------------------
# Parameter construction (synthetic; torch in_proj layout would need transpose)
# ---------------------------------------------------------------------------

def init_params(key, d_model):
    ks = jax.random.split(key, 8)
    s = d_model ** -0.5

    def nrm(k, shape):
        return s * jax.random.normal(k, shape, jnp.float32)

    wk = nrm(ks[0], (d_model, d_model))
    wv = nrm(ks[1], (d_model, d_model))
    bk = nrm(ks[2], (1, d_model))
    bv = nrm(ks[3], (1, d_model))
    return {
        "wq": nrm(ks[4], (d_model, d_model)),
        "bq": nrm(ks[5], (1, d_model)),
        "wkv": jnp.concatenate([wk, wv], axis=1),     # (D, 2D)
        "bkv": jnp.concatenate([bk, bv], axis=1),     # (1, 2D)
        "wo": nrm(ks[6], (d_model, d_model)),
        "bo": nrm(ks[7], (1, d_model)),
    }


# ---------------------------------------------------------------------------
# Pure-JAX reference (for a loose numerical check)
# ---------------------------------------------------------------------------

def mha_reference(q, kv, params, num_heads):
    B, Sq, D = q.shape
    Sk = kv.shape[1]
    dh = D // num_heads
    qp = q @ params["wq"] + params["bq"]
    kvp = kv @ params["wkv"] + params["bkv"]
    k, v = kvp[..., :D], kvp[..., D:]

    def split(x):
        return x.reshape(B, -1, num_heads, dh).transpose(0, 2, 1, 3)

    qh, kh, vh = split(qp), split(k), split(v)
    s = jnp.einsum("bhqd,bhkd->bhqk", qh, kh) / jnp.sqrt(float(dh))
    p = jax.nn.softmax(s, axis=-1)
    ctx = jnp.einsum("bhqk,bhkd->bhqd", p, vh)
    ctx = ctx.transpose(0, 2, 1, 3).reshape(B, Sq, D)
    out = ctx @ params["wo"] + params["bo"]
    return out, p.mean(axis=1)


# ---------------------------------------------------------------------------
# main
# ---------------------------------------------------------------------------

if __name__ == "__main__":
    B = 2
    Sq = 8          # query (prompt) tokens
    Sk = 16         # key/value (image) tokens
    d_model = 128   # lane-dense feature width
    num_heads = 4

    params = init_params(jax.random.PRNGKey(42), d_model)

    key = jax.random.PRNGKey(0)
    kq, kkv = jax.random.split(key)
    q_tensors = jax.random.normal(kq, (B, Sq, d_model), jnp.float32)
    kv_tensors = jax.random.normal(kkv, (B, Sk, d_model), jnp.float32)

    fwd = jax.jit(functools.partial(multihead_cross_attention_map,
                                    params=params, num_heads=num_heads))
    attn_out, attn_weights = fwd(q_tensors, kv_tensors)
    jax.block_until_ready((attn_out, attn_weights))

    assert attn_out.shape == (B, Sq, d_model)
    assert attn_weights.shape == (B, Sq, Sk)

    ref_out, ref_w = mha_reference(q_tensors, kv_tensors, params, num_heads)
    # approx reciprocal in the softmax -> loose tolerance
    assert jnp.allclose(attn_out, ref_out, rtol=2e-2, atol=2e-2)
    assert jnp.allclose(attn_weights, ref_w, rtol=2e-2, atol=2e-2)

    print("KERNEL_OK")
</pallas_src>

<mosaic_0001>
module attributes {stable_mosaic.version = 11 : i64} {
  func.func @_mha_fused_kernel(%arg0: i32, %arg1: memref<1x8x128xf32, #tpu.memory_space<vmem>>, %arg2: memref<1x16x128xf32, #tpu.memory_space<vmem>>, %arg3: memref<128x128xf32, #tpu.memory_space<vmem>>, %arg4: memref<1x128xf32, #tpu.memory_space<vmem>>, %arg5: memref<128x256xf32, #tpu.memory_space<vmem>>, %arg6: memref<1x256xf32, #tpu.memory_space<vmem>>, %arg7: memref<128x128xf32, #tpu.memory_space<vmem>>, %arg8: memref<1x128xf32, #tpu.memory_space<vmem>>, %arg9: memref<1x8x128xf32, #tpu.memory_space<vmem>>, %arg10: memref<1x8x16xf32, #tpu.memory_space<vmem>>) attributes {dimension_semantics = [#tpu.dimension_semantics<parallel>], iteration_bounds = array<i64: 2>, scalar_prefetch = 0 : i64, scratch_operands = 0 : i64, tpu.core_type = #tpu.core_type<tc>, window_params = [{transform_indices = @transform_0, window_bounds = array<i64: 1, 8, 128>}, {transform_indices = @transform_1, window_bounds = array<i64: 1, 16, 128>}, {pipeline_mode = #tpu.pipeline_mode<synchronous>, transform_indices = @transform_2, window_bounds = array<i64: 128, 128>}, {pipeline_mode = #tpu.pipeline_mode<synchronous>, transform_indices = @transform_3, window_bounds = array<i64: 1, 128>}, {pipeline_mode = #tpu.pipeline_mode<synchronous>, transform_indices = @transform_4, window_bounds = array<i64: 128, 256>}, {pipeline_mode = #tpu.pipeline_mode<synchronous>, transform_indices = @transform_5, window_bounds = array<i64: 1, 256>}, {pipeline_mode = #tpu.pipeline_mode<synchronous>, transform_indices = @transform_6, window_bounds = array<i64: 128, 128>}, {pipeline_mode = #tpu.pipeline_mode<synchronous>, transform_indices = @transform_7, window_bounds = array<i64: 1, 128>}, {transform_indices = @transform_8, window_bounds = array<i64: 1, 8, 128>}, {transform_indices = @transform_9, window_bounds = array<i64: 1, 8, 16>}]} {
    %c0 = arith.constant 0 : index
    %c0_0 = arith.constant 0 : index
    %c0_1 = arith.constant 0 : index
    %0 = vector.load %arg1[%c0, %c0_0, %c0_1] : memref<1x8x128xf32, #tpu.memory_space<vmem>>, vector<1x8x128xf32>
    %1 = vector.shape_cast %0 : vector<1x8x128xf32> to vector<8x128xf32>
    %c0_2 = arith.constant 0 : index
    %c0_3 = arith.constant 0 : index
    %c0_4 = arith.constant 0 : index
    %2 = vector.load %arg2[%c0_2, %c0_3, %c0_4] : memref<1x16x128xf32, #tpu.memory_space<vmem>>, vector<1x16x128xf32>
    %3 = vector.shape_cast %2 : vector<1x16x128xf32> to vector<16x128xf32>
    %c0_5 = arith.constant 0 : index
    %c0_6 = arith.constant 0 : index
    %4 = vector.load %arg3[%c0_5, %c0_6] : memref<128x128xf32, #tpu.memory_space<vmem>>, vector<128x128xf32>
    %cst = arith.constant dense<0.000000e+00> : vector<8x128xf32>
    %5 = tpu.matmul %1, %4, %cst {dimension_numbers = #tpu.dot_dimension_numbers<[1], [0], [0], [1], [0, 0, 1, 1], [], []>} : vector<8x128xf32>, vector<128x128xf32>, vector<8x128xf32> -> vector<8x128xf32>
    %c0_7 = arith.constant 0 : index
    %c0_8 = arith.constant 0 : index
    %6 = vector.load %arg4[%c0_7, %c0_8] : memref<1x128xf32, #tpu.memory_space<vmem>>, vector<1x128xf32>
    %7 = vector.broadcast %6 : vector<1x128xf32> to vector<8x128xf32>
    %8 = arith.addf %5, %7 : vector<8x128xf32>
    %c0_9 = arith.constant 0 : index
    %c0_10 = arith.constant 0 : index
    %9 = vector.load %arg5[%c0_9, %c0_10] : memref<128x256xf32, #tpu.memory_space<vmem>>, vector<128x256xf32>
    %cst_11 = arith.constant dense<0.000000e+00> : vector<16x256xf32>
    %10 = tpu.matmul %3, %9, %cst_11 {dimension_numbers = #tpu.dot_dimension_numbers<[1], [0], [0], [1], [0, 0, 1, 1], [], []>} : vector<16x128xf32>, vector<128x256xf32>, vector<16x256xf32> -> vector<16x256xf32>
    %c0_12 = arith.constant 0 : index
    %c0_13 = arith.constant 0 : index
    %11 = vector.load %arg6[%c0_12, %c0_13] : memref<1x256xf32, #tpu.memory_space<vmem>>, vector<1x256xf32>
    %12 = vector.broadcast %11 : vector<1x256xf32> to vector<16x256xf32>
    %13 = arith.addf %10, %12 : vector<16x256xf32>
    %14 = vector.extract_strided_slice %13 {offsets = [0, 0], sizes = [16, 128], strides = [1, 1]} : vector<16x256xf32> to vector<16x128xf32>
    %15 = vector.extract_strided_slice %13 {offsets = [0, 128], sizes = [16, 128], strides = [1, 1]} : vector<16x256xf32> to vector<16x128xf32>
    %16 = vector.extract_strided_slice %8 {offsets = [0, 0], sizes = [8, 32], strides = [1, 1]} : vector<8x128xf32> to vector<8x32xf32>
    %17 = vector.extract_strided_slice %14 {offsets = [0, 0], sizes = [16, 32], strides = [1, 1]} : vector<16x128xf32> to vector<16x32xf32>
    %18 = vector.extract_strided_slice %15 {offsets = [0, 0], sizes = [16, 32], strides = [1, 1]} : vector<16x128xf32> to vector<16x32xf32>
    %cst_14 = arith.constant dense<0.000000e+00> : vector<8x16xf32>
    %19 = tpu.matmul %16, %17, %cst_14 {dimension_numbers = #tpu.dot_dimension_numbers<[1], [1], [0], [0], [0, 0, 1, 0], [], []>} : vector<8x32xf32>, vector<16x32xf32>, vector<8x16xf32> -> vector<8x16xf32>
    %cst_15 = arith.constant 0.176776692 : f32
    %20 = vector.broadcast %cst_15 : f32 to vector<8x16xf32>
    %21 = arith.mulf %19, %20 : vector<8x16xf32>
    %cst_16 = arith.constant dense<0xFF800000> : vector<8xf32>
    %22 = vector.multi_reduction <maximumf>, %21, %cst_16 [1] : vector<8x16xf32> to vector<8xf32>
    %23 = vector.shape_cast %22 : vector<8xf32> to vector<8x1xf32>
    %24 = vector.broadcast %23 : vector<8x1xf32> to vector<8x16xf32>
    %25 = arith.subf %21, %24 : vector<8x16xf32>
    %26 = math.exp %25 : vector<8x16xf32>
    %cst_17 = arith.constant dense<0.000000e+00> : vector<8xf32>
    %27 = vector.multi_reduction <add>, %26, %cst_17 [1] : vector<8x16xf32> to vector<8xf32>
    %28 = vector.shape_cast %27 : vector<8xf32> to vector<8x1xf32>
    %29 = tpu.reciprocal %28 {approx = true} : vector<8x1xf32> -> vector<8x1xf32>
    %30 = vector.broadcast %29 : vector<8x1xf32> to vector<8x16xf32>
    %31 = arith.mulf %26, %30 : vector<8x16xf32>
    %cst_18 = arith.constant dense<0.000000e+00> : vector<8x32xf32>
    %32 = tpu.matmul %31, %18, %cst_18 {dimension_numbers = #tpu.dot_dimension_numbers<[1], [0], [0], [1], [0, 0, 1, 1], [], []>} : vector<8x16xf32>, vector<16x32xf32>, vector<8x32xf32> -> vector<8x32xf32>
    %33 = vector.extract_strided_slice %8 {offsets = [0, 32], sizes = [8, 32], strides = [1, 1]} : vector<8x128xf32> to vector<8x32xf32>
    %34 = vector.extract_strided_slice %14 {offsets = [0, 32], sizes = [16, 32], strides = [1, 1]} : vector<16x128xf32> to vector<16x32xf32>
    %35 = vector.extract_strided_slice %15 {offsets = [0, 32], sizes = [16, 32], strides = [1, 1]} : vector<16x128xf32> to vector<16x32xf32>
    %cst_19 = arith.constant dense<0.000000e+00> : vector<8x16xf32>
    %36 = tpu.matmul %33, %34, %cst_19 {dimension_numbers = #tpu.dot_dimension_numbers<[1], [1], [0], [0], [0, 0, 1, 0], [], []>} : vector<8x32xf32>, vector<16x32xf32>, vector<8x16xf32> -> vector<8x16xf32>
    %cst_20 = arith.constant 0.176776692 : f32
    %37 = vector.broadcast %cst_20 : f32 to vector<8x16xf32>
    %38 = arith.mulf %36, %37 : vector<8x16xf32>
    %cst_21 = arith.constant dense<0xFF800000> : vector<8xf32>
    %39 = vector.multi_reduction <maximumf>, %38, %cst_21 [1] : vector<8x16xf32> to vector<8xf32>
    %40 = vector.shape_cast %39 : vector<8xf32> to vector<8x1xf32>
    %41 = vector.broadcast %40 : vector<8x1xf32> to vector<8x16xf32>
    %42 = arith.subf %38, %41 : vector<8x16xf32>
    %43 = math.exp %42 : vector<8x16xf32>
    %cst_22 = arith.constant dense<0.000000e+00> : vector<8xf32>
    %44 = vector.multi_reduction <add>, %43, %cst_22 [1] : vector<8x16xf32> to vector<8xf32>
    %45 = vector.shape_cast %44 : vector<8xf32> to vector<8x1xf32>
    %46 = tpu.reciprocal %45 {approx = true} : vector<8x1xf32> -> vector<8x1xf32>
    %47 = vector.broadcast %46 : vector<8x1xf32> to vector<8x16xf32>
    %48 = arith.mulf %43, %47 : vector<8x16xf32>
    %cst_23 = arith.constant dense<0.000000e+00> : vector<8x32xf32>
    %49 = tpu.matmul %48, %35, %cst_23 {dimension_numbers = #tpu.dot_dimension_numbers<[1], [0], [0], [1], [0, 0, 1, 1], [], []>} : vector<8x16xf32>, vector<16x32xf32>, vector<8x32xf32> -> vector<8x32xf32>
    %50 = arith.addf %31, %48 : vector<8x16xf32>
    %51 = vector.extract_strided_slice %8 {offsets = [0, 64], sizes = [8, 32], strides = [1, 1]} : vector<8x128xf32> to vector<8x32xf32>
    %52 = vector.extract_strided_slice %14 {offsets = [0, 64], sizes = [16, 32], strides = [1, 1]} : vector<16x128xf32> to vector<16x32xf32>
    %53 = vector.extract_strided_slice %15 {offsets = [0, 64], sizes = [16, 32], strides = [1, 1]} : vector<16x128xf32> to vector<16x32xf32>
    %cst_24 = arith.constant dense<0.000000e+00> : vector<8x16xf32>
    %54 = tpu.matmul %51, %52, %cst_24 {dimension_numbers = #tpu.dot_dimension_numbers<[1], [1], [0], [0], [0, 0, 1, 0], [], []>} : vector<8x32xf32>, vector<16x32xf32>, vector<8x16xf32> -> vector<8x16xf32>
    %cst_25 = arith.constant 0.176776692 : f32
    %55 = vector.broadcast %cst_25 : f32 to vector<8x16xf32>
    %56 = arith.mulf %54, %55 : vector<8x16xf32>
    %cst_26 = arith.constant dense<0xFF800000> : vector<8xf32>
    %57 = vector.multi_reduction <maximumf>, %56, %cst_26 [1] : vector<8x16xf32> to vector<8xf32>
    %58 = vector.shape_cast %57 : vector<8xf32> to vector<8x1xf32>
    %59 = vector.broadcast %58 : vector<8x1xf32> to vector<8x16xf32>
    %60 = arith.subf %56, %59 : vector<8x16xf32>
    %61 = math.exp %60 : vector<8x16xf32>
    %cst_27 = arith.constant dense<0.000000e+00> : vector<8xf32>
    %62 = vector.multi_reduction <add>, %61, %cst_27 [1] : vector<8x16xf32> to vector<8xf32>
    %63 = vector.shape_cast %62 : vector<8xf32> to vector<8x1xf32>
    %64 = tpu.reciprocal %63 {approx = true} : vector<8x1xf32> -> vector<8x1xf32>
    %65 = vector.broadcast %64 : vector<8x1xf32> to vector<8x16xf32>
    %66 = arith.mulf %61, %65 : vector<8x16xf32>
    %cst_28 = arith.constant dense<0.000000e+00> : vector<8x32xf32>
    %67 = tpu.matmul %66, %53, %cst_28 {dimension_numbers = #tpu.dot_dimension_numbers<[1], [0], [0], [1], [0, 0, 1, 1], [], []>} : vector<8x16xf32>, vector<16x32xf32>, vector<8x32xf32> -> vector<8x32xf32>
    %68 = arith.addf %50, %66 : vector<8x16xf32>
    %69 = vector.extract_strided_slice %8 {offsets = [0, 96], sizes = [8, 32], strides = [1, 1]} : vector<8x128xf32> to vector<8x32xf32>
    %70 = vector.extract_strided_slice %14 {offsets = [0, 96], sizes = [16, 32], strides = [1, 1]} : vector<16x128xf32> to vector<16x32xf32>
    %71 = vector.extract_strided_slice %15 {offsets = [0, 96], sizes = [16, 32], strides = [1, 1]} : vector<16x128xf32> to vector<16x32xf32>
    %cst_29 = arith.constant dense<0.000000e+00> : vector<8x16xf32>
    %72 = tpu.matmul %69, %70, %cst_29 {dimension_numbers = #tpu.dot_dimension_numbers<[1], [1], [0], [0], [0, 0, 1, 0], [], []>} : vector<8x32xf32>, vector<16x32xf32>, vector<8x16xf32> -> vector<8x16xf32>
    %cst_30 = arith.constant 0.176776692 : f32
    %73 = vector.broadcast %cst_30 : f32 to vector<8x16xf32>
    %74 = arith.mulf %72, %73 : vector<8x16xf32>
    %cst_31 = arith.constant dense<0xFF800000> : vector<8xf32>
    %75 = vector.multi_reduction <maximumf>, %74, %cst_31 [1] : vector<8x16xf32> to vector<8xf32>
    %76 = vector.shape_cast %75 : vector<8xf32> to vector<8x1xf32>
    %77 = vector.broadcast %76 : vector<8x1xf32> to vector<8x16xf32>
    %78 = arith.subf %74, %77 : vector<8x16xf32>
    %79 = math.exp %78 : vector<8x16xf32>
    %cst_32 = arith.constant dense<0.000000e+00> : vector<8xf32>
    %80 = vector.multi_reduction <add>, %79, %cst_32 [1] : vector<8x16xf32> to vector<8xf32>
    %81 = vector.shape_cast %80 : vector<8xf32> to vector<8x1xf32>
    %82 = tpu.reciprocal %81 {approx = true} : vector<8x1xf32> -> vector<8x1xf32>
    %83 = vector.broadcast %82 : vector<8x1xf32> to vector<8x16xf32>
    %84 = arith.mulf %79, %83 : vector<8x16xf32>
    %cst_33 = arith.constant dense<0.000000e+00> : vector<8x32xf32>
    %85 = tpu.matmul %84, %71, %cst_33 {dimension_numbers = #tpu.dot_dimension_numbers<[1], [0], [0], [1], [0, 0, 1, 1], [], []>} : vector<8x16xf32>, vector<16x32xf32>, vector<8x32xf32> -> vector<8x32xf32>
    %86 = arith.addf %68, %84 : vector<8x16xf32>
    %87 = tpu.concatenate %32, %49, %67, %85 in 1 : vector<8x32xf32>, vector<8x32xf32>, vector<8x32xf32>, vector<8x32xf32> -> vector<8x128xf32>
    %c0_34 = arith.constant 0 : index
    %c0_35 = arith.constant 0 : index
    %88 = vector.load %arg7[%c0_34, %c0_35] : memref<128x128xf32, #tpu.memory_space<vmem>>, vector<128x128xf32>
    %cst_36 = arith.constant dense<0.000000e+00> : vector<8x128xf32>
    %89 = tpu.matmul %87, %88, %cst_36 {dimension_numbers = #tpu.dot_dimension_numbers<[1], [0], [0], [1], [0, 0, 1, 1], [], []>} : vector<8x128xf32>, vector<128x128xf32>, vector<8x128xf32> -> vector<8x128xf32>
    %c0_37 = arith.constant 0 : index
    %c0_38 = arith.constant 0 : index
    %90 = vector.load %arg8[%c0_37, %c0_38] : memref<1x128xf32, #tpu.memory_space<vmem>>, vector<1x128xf32>
    %91 = vector.broadcast %90 : vector<1x128xf32> to vector<8x128xf32>
    %92 = arith.addf %89, %91 : vector<8x128xf32>
    %c0_39 = arith.constant 0 : index
    %c0_40 = arith.constant 0 : index
    %c0_41 = arith.constant 0 : index
    %93 = vector.load %arg9[%c0_39, %c0_40, %c0_41] : memref<1x8x128xf32, #tpu.memory_space<vmem>>, vector<1x8x128xf32>
    %94 = vector.shape_cast %93 : vector<1x8x128xf32> to vector<8x128xf32>
    %95 = vector.shape_cast %92 : vector<8x128xf32> to vector<1x8x128xf32>
    tpu.vector_store %arg9[%c0_39, %c0_40, %c0_41], %95 {strides = array<i32>} : memref<1x8x128xf32, #tpu.memory_space<vmem>>, vector<1x8x128xf32>,
    %cst_42 = arith.constant 2.500000e-01 : f32
    %96 = vector.broadcast %cst_42 : f32 to vector<8x16xf32>
    %97 = arith.mulf %86, %96 : vector<8x16xf32>
    %c0_43 = arith.constant 0 : index
    %c0_44 = arith.constant 0 : index
    %c0_45 = arith.constant 0 : index
    %98 = vector.load %arg10[%c0_43, %c0_44, %c0_45] : memref<1x8x16xf32, #tpu.memory_space<vmem>>, vector<1x8x16xf32>
    %99 = vector.shape_cast %98 : vector<1x8x16xf32> to vector<8x16xf32>
    %100 = vector.shape_cast %97 : vector<8x16xf32> to vector<1x8x16xf32>
    tpu.vector_store %arg10[%c0_43, %c0_44, %c0_45], %100 {strides = array<i32>} : memref<1x8x16xf32, #tpu.memory_space<vmem>>, vector<1x8x16xf32>,
    return
  }
  func.func @transform_0(%arg0: i32) -> (i32, i32, i32) {
    %c0_i32 = arith.constant 0 : i32
    %c0_i32_0 = arith.constant 0 : i32
    %c0_i32_1 = arith.constant 0 : i32
    return %arg0, %c0_i32, %c0_i32_0 : i32, i32, i32
  }
  func.func @transform_1(%arg0: i32) -> (i32, i32, i32) {
    %c0_i32 = arith.constant 0 : i32
    %c0_i32_0 = arith.constant 0 : i32
    %c0_i32_1 = arith.constant 0 : i32
    return %arg0, %c0_i32, %c0_i32_0 : i32, i32, i32
  }
  func.func @transform_2(%arg0: i32) -> (i32, i32) {
    %c0_i32 = arith.constant 0 : i32
    %c0_i32_0 = arith.constant 0 : i32
    %c0_i32_1 = arith.constant 0 : i32
    return %c0_i32, %c0_i32_0 : i32, i32
  }
  func.func @transform_3(%arg0: i32) -> (i32, i32) {
    %c0_i32 = arith.constant 0 : i32
    %c0_i32_0 = arith.constant 0 : i32
    %c0_i32_1 = arith.constant 0 : i32
    return %c0_i32, %c0_i32_0 : i32, i32
  }
  func.func @transform_4(%arg0: i32) -> (i32, i32) {
    %c0_i32 = arith.constant 0 : i32
    %c0_i32_0 = arith.constant 0 : i32
    %c0_i32_1 = arith.constant 0 : i32
    return %c0_i32, %c0_i32_0 : i32, i32
  }
  func.func @transform_5(%arg0: i32) -> (i32, i32) {
    %c0_i32 = arith.constant 0 : i32
    %c0_i32_0 = arith.constant 0 : i32
    %c0_i32_1 = arith.constant 0 : i32
    return %c0_i32, %c0_i32_0 : i32, i32
  }
  func.func @transform_6(%arg0: i32) -> (i32, i32) {
    %c0_i32 = arith.constant 0 : i32
    %c0_i32_0 = arith.constant 0 : i32
    %c0_i32_1 = arith.constant 0 : i32
    return %c0_i32, %c0_i32_0 : i32, i32
  }
  func.func @transform_7(%arg0: i32) -> (i32, i32) {
    %c0_i32 = arith.constant 0 : i32
    %c0_i32_0 = arith.constant 0 : i32
    %c0_i32_1 = arith.constant 0 : i32
    return %c0_i32, %c0_i32_0 : i32, i32
  }
  func.func @transform_8(%arg0: i32) -> (i32, i32, i32) {
    %c0_i32 = arith.constant 0 : i32
    %c0_i32_0 = arith.constant 0 : i32
    %c0_i32_1 = arith.constant 0 : i32
    return %arg0, %c0_i32, %c0_i32_0 : i32, i32, i32
  }
  func.func @transform_9(%arg0: i32) -> (i32, i32, i32) {
    %c0_i32 = arith.constant 0 : i32
    %c0_i32_0 = arith.constant 0 : i32
    %c0_i32_1 = arith.constant 0 : i32
    return %arg0, %c0_i32, %c0_i32_0 : i32, i32, i32
  }
}

</mosaic_0001>

<bundles_post_ra>
// kernel: multihead_cross_attention_map.1
= control target key start
LH: loop header
LB: loop body
LE: loop exit
PB: predicated region body
PF: predicated region fallthrough
CT: control target
= control target key end

     0   :  { %s1974_s0 = inlined_call_operand.hbm [shape: f32[2,8,128], index: 0, kind: input, shape index: {}]   ;;  %s1975_s1 = inlined_call_operand.hbm [shape: f32[2,16,128], index: 1, kind: input, shape index: {}]   ;;  %s1976_s2 = inlined_call_operand.hbm [shape: f32[128,128], index: 2, kind: input, shape index: {}]   ;;  %s1977_s3 = inlined_call_operand.hbm [shape: f32[1,128], index: 3, kind: input, shape index: {}]   ;;  %s1978_s4 = inlined_call_operand.hbm [shape: f32[128,256], index: 4, kind: input, shape index: {}]   ;;  %s1979_s5 = inlined_call_operand.vmem [shape: f32[1,256], index: 5, kind: input, shape index: {}]   ;;  %s1980_s6 = inlined_call_operand.hbm [shape: f32[128,128], index: 6, kind: input, shape index: {}]   ;;  %s1981_s7 = inlined_call_operand.vmem [shape: f32[1,128], index: 7, kind: input, shape index: {}]   ;;  %s1982_s8 = inlined_call_operand.hbm [shape: f32[2,8,128], index: 8, kind: output, shape index: {0}]   ;;  %s1983_s9 = inlined_call_operand.hbm [shape: f32[2,8,16], index: 9, kind: output, shape index: {1}]  }
   0x1   :  { %1990 = sst [smem:[#allocation27_spill]] %s1976_s2 }
   0x2   :  { %1991 = sst [smem:[#allocation28_spill]] %s1977_s3 }
   0x3   :  { %1992 = sst [smem:[#allocation29_spill]] %s1978_s4 }
   0x4   :  { %1993 = sst [smem:[#allocation30_spill]] %s1980_s6 }
   0x5   :  { %15 = vsyncpa [#allocation3], 0 }
   0x6   :  { %17 = vsyncpa [#allocation3 + $0x1], 0 }
   0x7   :  { %18 = vsyncpa [#allocation6], 0 }
   0x8   :  { %20 = vsyncpa [#allocation6 + $0x1], 0 }
   0x9   :  { %21 = vsyncpa [#allocation9], 0 }
   0xa   :  { %22 = vsyncpa [#allocation12], 0 }
   0xb   :  { %23 = vsyncpa [#allocation4], 0 }
   0xc   :  { %25 = vsyncpa [#allocation4 + $0x1], 0 }
   0xd   :  { %26 = vsyncpa [#allocation15], 0 }
   0xe   :  { %28 = vsyncpa [#allocation15 + $0x1], 0  ;;  %s1681_s30 = smov 0   ;;  %s1683_s10 = smov 0  }
   0xf   :  { %s1685_s11 = smov 0   ;;  %s1687_s12 = smov 0  }
  0x10 LB: > { %1994 = sst [smem:[#allocation23_spill]] %s1614_s11  ;;  %s1705_s16 = sadd.s32 4294967295, %s1618_s12   ;;  %s1618_s12 = sphi %s1687_s12, %s2013_s12   ;;  %s1614_s11 = sphi %s1685_s11, %s2015_s11   ;;  %s1610_s10 = sphi %s1683_s10, %s2017_s10   ;;  %s1606_s30 = sphi %s1681_s30, %s2016_s30  }
  0x11   : > { %s1995_s2 = sld [smem:[#allocation27_spill]]  ;;  %p1144_p0 = scmp.ge.s32.totalorder %s1618_s12, 1 }
  0x12   : > { %p55_p1 = scmp.eq.s32.totalorder %s1705_s16, 0  ;;  %p269_p2 = scmp.lt.s32.totalorder %s1618_s12, 3 }
  0x13   : > { %s1620_s18 = smov [#allocation7]   ;;  %s1997_s3 = sld [smem:[#allocation28_spill]] }
  0x14   : > { %p1710_p3 = pnand %p1144_p0, %p269_p2  ;;  %s282_s19 = sshll.u32 %s1620_s18, 4  ;;  %s283_s19 = int_to_ptr.vmem [resolvable:$true] %s282_s19 }
  0x15   : > { %s1999_s4 = sld [smem:[#allocation29_spill]]  ;;  %s1621_s27 = smov [#allocation8]  }
  0x16   : > { %p1211_p4 = pneg %p1710_p3  ;;  %s297_s28 = sshll.u32 %s1621_s27, 4  ;;  %s298_s28 = int_to_ptr.vmem [resolvable:$true] %s297_s28 }
  0x17   : > { %s280_s15 = sshll.u32 %s1995_s2, 4  ;;  %s1984_s29 = smov 128   ;;  %s281_s15 = int_to_ptr.hbm [resolvable:$true] %s280_s15 }
  0x18   : > { %p1722_p6 = pnand %p1211_p4, %p55_p1  ;;  %s1985_s13 = smov 8  }
  0x19   : > { %s295_s22 = sshll.u32 %s1997_s3, 4  ;;  %s1624_s14 = smov [#allocation10]   ;;  %s296_s22 = int_to_ptr.hbm [resolvable:$true] %s295_s22 }
  0x1a   : > { %1214 = dma.hbm_to_vmem [thread:$0]  (!%p1722_p6), %s281_s15, 2048, %s283_s19, [#allocation6], %s1984_s29, %s1984_s29, %s1985_s13  }
  0x1b   : > { %s306_s26 = sshll.u32 %s1999_s4, 4  ;;  %s308_s18 = sshll.u32 %s1624_s14, 4  ;;  %s307_s26 = int_to_ptr.hbm [resolvable:$true] %s306_s26  ;;  %s309_s18 = int_to_ptr.vmem [resolvable:$true] %s308_s18 }
  0x1c   : > { %1217 = dma.hbm_to_vmem [thread:$0]  (!%p1722_p6), %s296_s22, 16, %s298_s28, [#allocation9]  }
  0x1d   : > { %s2000_s6 = sld [smem:[#allocation30_spill]]  ;;  %s1625_s15 = smov 256  }
  0x1e   : > { %s1626_s19 = smov 16   ;;  %s1627_s22 = smov [#allocation11]  }
  0x1f   : > { %1220 = dma.hbm_to_vmem [thread:$0]  (!%p1722_p6), %s307_s26, 4096, %s309_s18, [#allocation9], %s1625_s15, %s1625_s15, %s1626_s19  }
  0x20   : > { %s325_s25 = sshll.u32 %s1627_s22, 4  ;;  %s1143_s27 = sadd.s32 4294967294, %s1618_s12   ;;  %s326_s25 = int_to_ptr.vmem [resolvable:$true] %s325_s25 }
  0x21   : > { %s1748_s28 = sadd.s32 1, %s1618_s12   ;;  %s41_s26 = sadd.s32 1, %s1614_s11 }
  0x22   : > { %2001 = sst [smem:[#allocation24_spill]] %s1748_s28  ;;  %s38_s14 = ssub.s32 %s1618_s12, %s1748_s28 }
  0x23   : > { %s323_s24 = sshll.u32 %s2000_s6, 4  ;;  %p39_p7 = scmp.eq.s32.totalorder %s38_s14, 0  ;;  %s324_s24 = int_to_ptr.hbm [resolvable:$true] %s323_s24 }
  0x24   : > { %1223 = dma.hbm_to_vmem [thread:$0]  (!%p1722_p6), %s324_s24, 2048, %s326_s25, [#allocation12], %s1984_s29, %s1984_s29, %s1985_s13  }
  0x25   : > { %p48_p8 = scmp.ne.s32.totalorder %s1614_s11, %s1610_s10  ;;  %p49_p9 = scmp.eq.s32.totalorder %s1618_s12, 0 }
  0x26   : > { %p54_p10 = scmp.ne.s32.totalorder %s1610_s10, %s1606_s30  ;;  %p230_p13 = scmp.eq.s32.totalorder %s1705_s16, 1 }
  0x27   : > { %s1759_s18 = scalar_select %p39_p7, %s1614_s11, %s41_s26  }
  0x28   : > { %p1761_p11 = por %p49_p9, %p48_p8  ;;  %p1767_p12 = por %p55_p1, %p54_p10 }
  0x29   : > { %2002 = sst [smem:[#allocation25_spill]] %s1759_s18  ;;  %p236_p0 = scmp.eq.s32.totalorder %s1143_s27, 1 }
  0x2a   : > { %p1242_p2 = scmp.lt.s32.totalorder %s1618_s12, 2  ;;  %s1774_s21 = sand.u32 1, %s1614_s11  }
  0x2b   : > { %p1776_p4 = por %p230_p13, %p48_p8  ;;  %p1780_p6 = por %p236_p0, %p54_p10 }
  0x2c   : > { %s1150_s19 = sshll.u32 %s1774_s21, 3  ;;  %s1151_s22 = sshll.u32 %s1618_s12, 3 }
  0x2d   : > { %s2006_s15 = scalar_select %p1780_p6, 1, 0 }
  0x2e   : > { %s350_s27 = scalar_lea.hbm %s1974_s0, %s1151_s22  ;;  %s346_s26 = scalar_lea.vmem [#allocation2], %s1150_s19 }
  0x2f   : > { %2007 = sst [smem:[#allocation26_spill]] %s2006_s15  ;;  %s354_s29 = sshll.u32 %s346_s26, 4  ;;  %s355_s29 = int_to_ptr.vmem [resolvable:$true] %s354_s29 }
  0x30   : > { %s352_s13 = sshll.u32 %s350_s27, 4  ;;  %p1791_p7 = pnand %p1242_p2, %p1761_p11  ;;  %s353_s13 = int_to_ptr.hbm [resolvable:$true] %s352_s13 }
  0x31   : > { %s1152_s3 = sshll.u32 %s1774_s21, 4  ;;  %s361_s4 = sand.u32 1, %s1618_s12  }
  0x32   : > { %s343_s6 = scalar_lea.sflag [#allocation3], %s1774_s21  ;;  %s1444_s18 = sshra.s32 %s353_s13, 4  ;;  %s1445_s18 = int_to_ptr.hbm [resolvable:$true] %s1444_s18 }
  0x33   : > { %s1446_s11 = scalar_lea.hbm %s1445_s18, 8  ;;  %p1448_p9 = pneg %p1791_p7 }
  0x34   : > { %p1447_p8 = scmp.ne.s32.totalorder %s1445_s18, %s1446_s11  ;;  %s1451_s22 = scalar_lea.hbm %s1974_s0, 16 }
  0x35   : > { %p1452_p11 = scmp.lt.s32.totalorder %s1445_s18, %s1974_s0  ;;  %p1453_p0 = scmp.lt.s32.totalorder %s1451_s22, %s1446_s11 }
  0x36   : > { %p1449_p10 = pnand %p1448_p9, %p1447_p8 }
  0x37   : > { %p1454_p2 = por %p1453_p0, %p1452_p11 }
  0x38   : > { %p1450_p13 = pneg %p1449_p10 }
  0x3a   : > { %p1455_p5 = pnand %p1454_p2, %p1450_p13 }
  0x3c   : > { %1458 = shalt.err (!%p1455_p5)
}
  0x3d   : > { %1227 = dma.hbm_to_vmem [thread:$0]  (!%p1791_p7), %s353_s13, 128, %s355_s29, %s343_s6  }
  0x3e   : > { %s365_s21 = scalar_lea.vmem [#allocation5], %s1152_s3  ;;  %s1186_s26 = sshll.u32 %s1618_s12, 4 }
  0x3f   : > { %s373_s27 = sshll.u32 %s365_s21, 4  ;;  %s370_s19 = scalar_lea.hbm %s1975_s1, %s1186_s26  ;;  %s374_s27 = int_to_ptr.vmem [resolvable:$true] %s373_s27 }
  0x40   : > { %s371_s15 = sshll.u32 %s370_s19, 4  ;;  %s362_s18 = scalar_lea.sflag [#allocation6], %s361_s4  ;;  %s372_s15 = int_to_ptr.hbm [resolvable:$true] %s371_s15 }
  0x41   : > { %s1474_s11 = sshra.s32 %s372_s15, 4  ;;  %s1481_s29 = scalar_lea.hbm %s1975_s1, 32  ;;  %s1475_s11 = int_to_ptr.hbm [resolvable:$true] %s1474_s11 }
  0x42   : > { %s1476_s22 = scalar_lea.hbm %s1475_s11, 16  ;;  %p1482_p13 = scmp.lt.s32.totalorder %s1475_s11, %s1975_s1 }
  0x43   : > { %p1477_p5 = scmp.ne.s32.totalorder %s1475_s11, %s1476_s22  ;;  %p1483_p11 = scmp.lt.s32.totalorder %s1481_s29, %s1476_s22 }
  0x45   : > { %p1479_p8 = pnand %p1477_p5, %p1448_p9  ;;  %p1484_p0 = por %p1483_p11, %p1482_p13 }
  0x47   : > { %p1480_p10 = pneg %p1479_p8 }
  0x49   : > { %p1485_p2 = pnand %p1484_p0, %p1480_p10 }
  0x4b   : > { %1488 = shalt.err (!%p1485_p2)
}
  0x4c   : > { %s2009_s4 = smov 8   ;;  %s2010_s28 = smov 128  }
  0x4d   : > { %1230 = dma.hbm_to_vmem [thread:$0]  (!%p1791_p7), %s372_s15, 256, %s374_s27, %s362_s18, %s2010_s28, %s2010_s28, %s2009_s4  }
  0x4e   : > { %385 = sbr.rel (%p1710_p3) target bundleno = 1454 (0x5ae), region = 52  ;;  %s1832_s14 = sand.u32 (!%p1710_p3), 1, %s1610_s10  }
  0x4f   : > { %s1835_s21 = sshll.u32 (!%p1710_p3), %s1832_s14, 3  ;;  %s388_s26 = scalar_lea.sflag (!%p1710_p3), [#allocation3], %s1832_s14 }
  0x50   : > { %s391_s23 = scalar_lea.vmem (!%p1710_p3), [#allocation2], %s1835_s21 }
  0x53   : > { %1577 = dma.done.wait (%p1767_p12), %s388_s26, 128  }
  0x54   : > { %1579 = vsyncadd (%p1767_p12), %s388_s26, 4294967168  ;;  %s397_s2 = sand.u32 1, %s1705_s16   ;;  %s1157_s17 = sshll.u32 %s1832_s14, 4 }
  0x55   : > { %s398_s15 = scalar_lea.sflag [#allocation6], %s397_s2  ;;  %s1845_s27 = scalar_lea.vmem [#allocation5], %s1157_s17 }
  0x56   : > { %1581 = dma.done.wait (%p1767_p12), %s398_s15, 256  }
  0x57   : > { %1583 = vsyncadd (%p1767_p12), %s398_s15, 4294967040 }
  0x58   : > { %1585 = dma.done.wait (%p55_p1), [#allocation6], 2048  }
  0x59   : > { %1587 = vsyncadd (%p55_p1), [#allocation6], 4294965248 }
  0x5a   : > { %1589 = dma.done.wait (%p55_p1), [#allocation9], 4112  }
  0x5b   : > { %1591 = vsyncadd (%p55_p1), [#allocation9], 4294963184 }
  0x5c   : > { %1593 = dma.done.wait (%p55_p1), [#allocation12], 2048  }
  0x5d   : > { %1595 = vsyncadd (%p55_p1), [#allocation12], 4294965248  ;;  %v485_v0 = vld [vmem:[#allocation7 + $0x78] sm:$0xff]  ;;  %v484_v2 = vld [vmem:[#allocation7 + $0x70] sm:$0xff]  ;;  %s1628_s20 = smov 96   ;;  %vm594_vm0 = vcmask 261120  }
  0x5e   : > { %v540_v1 = vld [vmem:[#allocation10 + $0xf0] sm:$0xff]  ;;  %490 = vmatpush.msra.mxu0 %v485_v0  ;;  %v538_v3 = vld [vmem:[#allocation10 + $0xe0] sm:$0xff]  ;;  %v541_v14 = vld [vmem:[#allocation10 + $0xf8] sm:$0xff]  ;;  %s1629_s11 = smov 64   ;;  %s1630_s22 = smov 32   ;;  %vm625_vm1 = vcmask 130048  }
  0x5f   : > { %548 = vmatpush.msra.mxu1 %v540_v1  ;;  %v483_v4 = vld [vmem:[#allocation7 + $0x68] sm:$0xff]  ;;  %v536_v5 = vld [vmem:[#allocation10 + $0xd0] sm:$0xff]  ;;  %v482_v6 = vld [vmem:[#allocation7 + $0x60] sm:$0xff]  ;;  %571 = vmatpush.msra.mxu2 %v541_v14  ;;  %s466_s6 = scalar_lea.vmem [#allocation14], %s1835_s21  ;;  %vm897_vm2 = vcmask 523264   ;;  %vm899_vm3 = vcmask 785408  }
  0x60   : > { %491 = vmatpush.msra.mxu0 %v484_v2  ;;  %v534_v7 = vld [vmem:[#allocation10 + $0xc0] sm:$0xff]  ;;  %v481_v8 = vld [vmem:[#allocation7 + $0x58] sm:$0xff]  ;;  %v480_v10 = vld [vmem:[#allocation7 + $0x50] sm:$0xff]  ;;  %s1182_s3 = sshll.u32 %s1705_s16, 3  ;;  %s976_s4 = sshll.u32 %s466_s6, 4  ;;  %s977_s4 = int_to_ptr.vmem [resolvable:$true] %s976_s4 }
  0x61   : > { %549 = vmatpush.msra.mxu1 %v538_v3  ;;  %v532_v9 = vld [vmem:[#allocation10 + $0xb0] sm:$0xff]  ;;  %v530_v11 = vld [vmem:[#allocation10 + $0xa0] sm:$0xff]  ;;  %v539_v17 = vld [vmem:[#allocation10 + $0xe8] sm:$0xff]  ;;  %s974_s25 = scalar_lea.hbm %s1983_s9, %s1182_s3  ;;  %s950_s26 = scalar_lea.sflag [#allocation15], %s1832_s14 }
  0x62   : > { %492 = vmatpush.msra.mxu0 %v483_v4  ;;  %v479_v12 = vld [vmem:[#allocation7 + $0x48] sm:$0xff]  ;;  %v528_v13 = vld [vmem:[#allocation10 + $0x90] sm:$0xff]  ;;  %v478_v15 = vld [vmem:[#allocation7 + $0x40] sm:$0xff]  ;;  %572 = vmatpush.msra.mxu2 %v539_v17  ;;  %s978_s28 = sshll.u32 %s974_s25, 4  ;;  %s1524_s16 = scalar_lea.hbm %s1983_s9, 16  ;;  %s979_s28 = int_to_ptr.hbm [resolvable:$true] %s978_s28 }
  0x63   : > { %550 = vmatpush.msra.mxu1 %v536_v5  ;;  %v526_v16 = vld [vmem:[#allocation10 + $0x80] sm:$0xff]  ;;  %v537_v18 = vld [vmem:[#allocation10 + $0xd8] sm:$0xff]  ;;  %v524_v20 = vld [vmem:[#allocation10 + $0x70] sm:$0xff] }
  0x64   : > { %493 = vmatpush.msra.mxu0 %v482_v6  ;;  %v477_v19 = vld [vmem:[#allocation7 + $0x38] sm:$0xff]  ;;  %v535_v21 = vld [vmem:[#allocation10 + $0xc8] sm:$0xff]  ;;  %v522_v23 = vld [vmem:[#allocation10 + $0x60] sm:$0xff]  ;;  %573 = vmatpush.msra.mxu2 %v537_v18 }
  0x65   : > { %551 = vmatpush.msra.mxu1 %v534_v7  ;;  %v476_v22 = vld [vmem:[#allocation7 + $0x30] sm:$0xff]  ;;  %v533_v24 = vld [vmem:[#allocation10 + $0xb8] sm:$0xff]  ;;  %v475_v25 = vld [vmem:[#allocation7 + $0x28] sm:$0xff] }
  0x66   : > { %494 = vmatpush.msra.mxu0 %v481_v8  ;;  %v520_v26 = vld [vmem:[#allocation10 + $0x50] sm:$0xff]  ;;  %574 = vmatpush.msra.mxu2 %v535_v21  ;;  %v531_v27 = vld [vmem:[#allocation10 + $0xa8] sm:$0xff]  ;;  %v474_v28 = vld [vmem:[#allocation7 + $0x20] sm:$0xff] }
  0x67   : > { %552 = vmatpush.msra.mxu1 %v532_v9  ;;  %v518_v29 = vld [vmem:[#allocation10 + $0x40] sm:$0xff]  ;;  %v529_v30 = vld [vmem:[#allocation10 + $0x98] sm:$0xff]  ;;  %v516_v32 = vld [vmem:[#allocation10 + $0x30] sm:$0xff] }
  0x68   : > { %495 = vmatpush.msra.mxu0 %v480_v10  ;;  %575 = vmatpush.msra.mxu2 %v533_v24  ;;  %v473_v31 = vld [vmem:[#allocation7 + $0x18] sm:$0xff]  ;;  %v527_v33 = vld [vmem:[#allocation10 + $0x88] sm:$0xff]  ;;  %v514_v35 = vld [vmem:[#allocation10 + $0x20] sm:$0xff] }
  0x69   : > { %553 = vmatpush.msra.mxu1 %v530_v11  ;;  %v472_v34 = vld [vmem:[#allocation7 + $0x10] sm:$0xff]  ;;  %v525_v36 = vld [vmem:[#allocation10 + $0x78] sm:$0xff]  ;;  %v471_v37 = vld [vmem:[#allocation7 + $0x8] sm:$0xff] }
  0x6a   : > { %496 = vmatpush.msra.mxu0 %v479_v12  ;;  %576 = vmatpush.msra.mxu2 %v531_v27  ;;  %v512_v38 = vld [vmem:[#allocation10 + $0x10] sm:$0xff]  ;;  %v523_v39 = vld [vmem:[#allocation10 + $0x68] sm:$0xff]  ;;  %v470_v40 = vld [vmem:[#allocation7] sm:$0xff] }
  0x6b   : > { %554 = vmatpush.msra.mxu1 %v528_v13  ;;  %v510_v41 = vld [vmem:[#allocation10] sm:$0xff]  ;;  %v467_v42 = vld [vmem:[%s391_s23] sm:$0xff]  ;;  %v1306_v51 = vld [vmem:[#allocation8] ss:$0 sm:$0xff]  ;;  %s1518_s23 = sshra.s32 %s979_s28, 4  ;;  %s1519_s23 = int_to_ptr.hbm [resolvable:$true] %s1518_s23 }
  0x6c   : > { %497 = vmatpush.msra.mxu0 %v478_v15  ;;  %577 = vmatpush.msra.mxu2 %v529_v30  ;;  %v468_v43 = vld [vmem:[%s1845_s27] sm:$0xff]  ;;  %v469_v48 = vld [vmem:[%s1845_s27 + $0x8] sm:$0xff]  ;;  %s1520_s2 = scalar_lea.hbm %s1519_s23, 8  ;;  %p1525_p7 = scmp.lt.s32.totalorder %s1519_s23, %s1983_s9 }
  0x6d   : > { %555 = vmatpush.msra.mxu1 %v526_v16  ;;  %v521_v44 = vld [vmem:[#allocation10 + $0x58] sm:$0xff]  ;;  %v519_v45 = vld [vmem:[#allocation10 + $0x48] sm:$0xff]  ;;  %p1521_p1 = scmp.ne.s32.totalorder %s1519_s23, %s1520_s2  ;;  %p1526_p9 = scmp.lt.s32.totalorder %s1524_s16, %s1520_s2 }
  0x6e   : > { %498 = vmatpush.msra.mxu0 %v477_v19  ;;  %578 = vmatpush.msra.mxu2 %v527_v33  ;;  %v517_v46 = vld [vmem:[#allocation10 + $0x38] sm:$0xff]  ;;  %v515_v47 = vld [vmem:[#allocation10 + $0x28] sm:$0xff] }
  0x6f   : > { %556 = vmatpush.msra.mxu1 %v524_v20  ;;  %v513_v49 = vld [vmem:[#allocation10 + $0x18] sm:$0xff]  ;;  %v511_v50 = vld [vmem:[#allocation10 + $0x8] sm:$0xff]  ;;  %p1522_p3 = pnand %p1521_p1, %p1776_p4  ;;  %p1527_p5 = por %p1526_p9, %p1525_p7 }
  0x70   : > { %499 = vmatpush.msra.mxu0 %v476_v22  ;;  %579 = vmatpush.msra.mxu2 %v525_v36  ;;  %v542_v55 = vld [vmem:[%s1979_s5] sm:$0x3] }
  0x71   : > { %557 = vmatpush.msra.mxu1 %v522_v23  ;;  %v544_v56 = vperm.slane %v542_v55, 0  ;;  %v545_v61 = vperm.slane %v542_v55, 1  ;;  %p1523_p12 = pneg %p1522_p3 }
  0x72   : > { %500 = vmatpush.msra.mxu0 %v475_v25  ;;  %580 = vmatpush.msra.mxu2 %v523_v39 }
  0x73   : > { %558 = vmatpush.msra.mxu1 %v520_v26  ;;  %p1528_p8 = pnand %p1527_p5, %p1523_p12 }
  0x74   : > { %501 = vmatpush.msra.mxu0 %v474_v28  ;;  %581 = vmatpush.msra.mxu2 %v521_v44 }
  0x75   : > { %559 = vmatpush.msra.mxu1 %v518_v29 }
  0x76   : > { %502 = vmatpush.msra.mxu0 %v473_v31  ;;  %582 = vmatpush.msra.mxu2 %v519_v45 }
  0x77   : > { %560 = vmatpush.msra.mxu1 %v516_v32 }
  0x78   : > { %503 = vmatpush.msra.mxu0 %v472_v34  ;;  %583 = vmatpush.msra.mxu2 %v517_v46 }
  0x79   : > { %561 = vmatpush.msra.mxu1 %v514_v35 }
  0x7a   : > { %504 = vmatpush.msra.mxu0 %v471_v37  ;;  %584 = vmatpush.msra.mxu2 %v515_v47 }
  0x7b   : > { %562 = vmatpush.msra.mxu1 %v512_v38 }
  0x7c   : > { %505 = vmatpush.msra.mxu0 %v470_v40  ;;  %585 = vmatpush.msra.mxu2 %v513_v49 }
  0x7d   : > { %563 = vmatpush.msra.mxu1 %v510_v41  ;;  %506 = vmatmul.f32.vlgmr.msra.gmra.mxu0 %v467_v42 }
  0x7e   : > { %564 = vmatmul.f32.vlgmr.msra.gmra.mxu1 %v468_v43  ;;  %586 = vmatpush.msra.mxu2 %v511_v50 }
  0x7f   : > { %587 = vmatmul.f32.vlgmr.msra.gmra.mxu2 %v468_v43 }
  0x86   : > { %567 = vmatmul.f32.gmra.mxu1 %v469_v48 }
  0x87   : > { %590 = vmatmul.f32.gmra.mxu2 %v469_v48 }
  0xfa   : > { %v507_v52 = vpop.f32.mrf.mxu0 }
  0xfb   : > { %v565_v53 = vpop.f32.mrf.mxu1  ;;  %v508_v54 = vadd.f32 %v1306_v51, %v507_v52 }
  0xfc   : > { %v566_v59 = vadd.f32 %v565_v53, %v544_v56 }
  0xfd   : > { %660 = vrot.lane.b32.xlu2 %v508_v54, %s1628_s20 }
 0x102   : > { %v588_v60 = vpop.f32.mrf.mxu2 }
 0x103   : > { %v568_v57 = vpop.f32.mrf.mxu1  ;;  %v589_v63 = vadd.f32 %v588_v60, %v545_v61 }
 0x104   : > { %v569_v58 = vadd.f32 %v568_v57, %v544_v56 }
 0x106   : > { %664 = vrot.lane.b32.xlu1 %v569_v58, %s1628_s20  ;;  %1164 = vmatpush.xpose.msk.msra.mxu3 %vm594_vm0, %v569_v58 }
 0x107   : > { %740 = vrot.lane.b32.xlu2 %v569_v58, %s1629_s11 }
 0x10a   : > { %1165 = vmatpush.xpose.msk.msra.mxu3 %vm594_vm0, %v566_v59  ;;  %v591_v62 = vpop.f32.mrf.mxu2 }
 0x10b   : > { %v592_v0 = vadd.f32 %v591_v62, %v545_v61 }
 0x10d   : > { %1166 = vmatmul.msk.f32.vlgmr.msra.gmra.mxu3 %vm594_vm0, %v508_v54  ;;  %v1291_v31 = vpack.i.bf16 %v589_v63, %v592_v0 }
 0x10e   : > { %662 = vrot.lane.b32.xlu1 %v566_v59, %s1628_s20  ;;  %654 = vmatpush.msrb.mxu3 %v592_v0 }
 0x10f   : > { %814 = vrot.lane.b32.xlu2 %v569_v58, %s1630_s22 }
 0x110   : > { %655 = vmatpush.msrb.mxu3 %v589_v63 }
 0x116   : > { %736 = vrot.lane.b32.xlu1 %v508_v54, %s1629_s11 }
 0x117   : > { %810 = vrot.lane.b32.xlu2 %v508_v54, %s1630_s22 }
 0x11e   : > { %812 = vrot.lane.b32.xlu1 %v566_v59, %s1630_s22 }
 0x157   : > { %v661_v1 = vpop.permute.xlu2 %660 }
 0x161   : > { %v741_v2 = vpop.permute.xlu2 %740 }
 0x162   : > { %1172 = vmatpush.xpose.msk.msrb.mxu0 %vm594_vm0, %v741_v2 }
 0x169   : > { %v815_v18 = vpop.permute.xlu2 %814 }
 0x171   : > { %v811_v20 = vpop.permute.xlu2 %810 }
 0x178   : > { %v665_v3 = vpop.permute.xlu1 %664 }
 0x179   : > { %1168 = vmatpush.xpose.msk.msra.mxu3 %vm594_vm0, %v665_v3 }
 0x180   : > { %v663_v4 = vpop.permute.xlu1 %662 }
 0x181   : > { %1169 = vmatpush.xpose.msk.msra.mxu3 %vm594_vm0, %v663_v4 }
 0x188   : > { %v737_v16 = vpop.permute.xlu1 %736 }
 0x190   : > { %v621_v5 = vpop.f32.mrf.mxu3  ;;  %v813_v19 = vpop.permute.xlu1 %812 }
 0x191   : > { %v624_v6 = vmul.f32 0.17677669, %v621_v5 }
 0x193   : > { %v626_v7 = vsel %vm625_vm1, %v624_v6, -inf }
 0x194   : > { %627 = vmax.xlane.f32.xlu0 %v626_v7 }
 0x207   : > { %v628_v8 = vpop.xlane.xlu0 %627 }
 0x208   : > { %v629_v9 = vsub.f32 %v624_v6, %v628_v8  ;;  %v916_v8 = vld [vmem:[#allocation11 + $0x78] sm:$0xff] }
 0x209   : > { %921 = vmatpush.msrb.mxu2 %v916_v8 }
 0x20a   : > { %v630_v10 = vmul.f32 1.442695, %v629_v9  ;;  %v915_v9 = vld [vmem:[#allocation11 + $0x70] sm:$0xff] }
 0x20b   : > { %922 = vmatpush.msrb.mxu2 %v915_v9 }
 0x20c   : > { %1308 = vpow2.f32 %v630_v10  ;;  %v914_v10 = vld [vmem:[#allocation11 + $0x68] sm:$0xff] }
 0x20d   : > { %923 = vmatpush.msrb.mxu2 %v914_v10 }
 0x212   : > { %v1309_v11 = vpop.eup %1308 }
 0x213   : > { %v632_v12 = vsel %vm625_vm1, %v1309_v11, 0.0 }
 0x214   : > { %633 = vadd.xlane.f32.xlu0 %v632_v12  ;;  %v912_v12 = vld [vmem:[#allocation11 + $0x58] sm:$0xff] }
 0x228   : > { %738 = vrot.lane.b32.xlu0 %v566_v59, %s1629_s11 }
 0x287   : > { %v634_v13 = vpop.xlane.xlu0 %633 }
 0x288   : > { %1310 = vrcp.f32 %v634_v13  ;;  %v911_v13 = vld [vmem:[#allocation11 + $0x50] sm:$0xff] }
 0x28e   : > { %v1311_v14 = vpop.eup %1310 }
 0x28f   : > { %v1887_v15 = vmul.f32 %v1311_v14, %v1309_v11  ;;  %v913_v11 = vld [vmem:[#allocation11 + $0x60] sm:$0xff]  ;;  %v910_v14 = vld [vmem:[#allocation11 + $0x48] sm:$0xff] }
 0x290   : > { %924 = vmatpush.msrb.mxu2 %v913_v11 }
 0x291   : > { %1167 = vmatmul.msk.f32.vlgmr.msrb.gmra.mxu3 %vm625_vm1, %v1887_v15 }
 0x292   : > { %925 = vmatpush.msrb.mxu2 %v912_v12 }
 0x294   : > { %926 = vmatpush.msrb.mxu2 %v911_v13 }
 0x296   : > { %927 = vmatpush.msrb.mxu2 %v910_v14 }
 0x299   : > { %1170 = vmatmul.msk.f32.vlgmr.msra.gmra.mxu3 %vm594_vm0, %v661_v1 }
 0x29a   : > { %v739_v17 = vpop.permute.xlu0 %738 }
 0x29b   : > { %1173 = vmatpush.xpose.msk.msrb.mxu0 %vm594_vm0, %v739_v17  ;;  %v907_v17 = vld [vmem:[#allocation11 + $0x30] sm:$0xff] }
 0x29e   : > { %1174 = vmatmul.msk.f32.vlgmr.msrb.gmra.mxu0 %vm594_vm0, %v737_v16  ;;  %v908_v16 = vld [vmem:[#allocation11 + $0x38] sm:$0xff] }
 0x29f   : > { %1176 = vmatpush.xpose.msk.msra.mxu0 %vm594_vm0, %v815_v18  ;;  %v906_v18 = vld [vmem:[#allocation11 + $0x28] sm:$0xff] }
 0x2a3   : > { %1177 = vmatpush.xpose.msk.msra.mxu0 %vm594_vm0, %v813_v19  ;;  %v905_v19 = vld [vmem:[#allocation11 + $0x20] sm:$0xff] }
 0x2a6   : > { %1178 = vmatmul.msk.f32.vlgmr.msra.gmra.mxu0 %vm594_vm0, %v811_v20  ;;  %v904_v20 = vld [vmem:[#allocation11 + $0x18] sm:$0xff] }
 0x314   : > { %v1897_v21 = vpop.f32.mrf.mxu3 }
 0x31b   : > { %v765_v22 = vpop.f32.mrf.mxu0 }
 0x31c   : > { %v768_v23 = vmul.f32 0.17677669, %v765_v22  ;;  %v689_v24 = vpop.f32.mrf.mxu3  ;;  %v903_v22 = vld [vmem:[#allocation11 + $0x10] sm:$0xff] }
 0x31d   : > { %v692_v25 = vmul.f32 0.17677669, %v689_v24  ;;  %v901_v24 = vld [vmem:[#allocation11] sm:$0xff] }
 0x31e   : > { %v769_v26 = vsel %vm625_vm1, %v768_v23, -inf }
 0x31f   : > { %770 = vmax.xlane.f32.xlu2 %v769_v26  ;;  %v693_v27 = vsel %vm625_vm1, %v692_v25, -inf }
 0x320   : > { %694 = vmax.xlane.f32.xlu1 %v693_v27 }
 0x323   : > { %v839_v28 = vpop.f32.mrf.mxu0 }
 0x324   : > { %v842_v29 = vmul.f32 0.17677669, %v839_v28 }
 0x326   : > { %v843_v30 = vsel %vm625_vm1, %v842_v29, -inf }
 0x327   : > { %844 = vmax.xlane.f32.xlu0 %v843_v30 }
 0x339   : > { %1292 = vrot.lane.b32.xlu1 %v1291_v31, %s1628_s20 }
 0x392   : > { %v771_v32 = vpop.xlane.xlu2 %770 }
 0x393   : > { %v772_v33 = vsub.f32 %v768_v23, %v771_v32  ;;  %v695_v34 = vpop.xlane.xlu1 %694  ;;  %v902_v23 = vld [vmem:[#allocation11 + $0x8] sm:$0xff] }
 0x394   : > { %v696_v35 = vsub.f32 %v692_v25, %v695_v34 }
 0x395   : > { %v773_v36 = vmul.f32 1.442695, %v772_v33 }
 0x396   : > { %v697_v37 = vmul.f32 1.442695, %v696_v35 }
 0x397   : > { %1312 = vpow2.f32 %v773_v36 }
 0x398   : > { %1314 = vpow2.f32 %v697_v37 }
 0x39a   : > { %v845_v38 = vpop.xlane.xlu0 %844 }
 0x39b   : > { %v846_v39 = vsub.f32 %v842_v29, %v845_v38 }
 0x39d   : > { %v1313_v40 = vpop.eup %1312  ;;  %v847_v41 = vmul.f32 1.442695, %v846_v39 }
 0x39e   : > { %v1315_v42 = vpop.eup %1314  ;;  %v775_v43 = vsel %vm625_vm1, %v1313_v40, 0.0 }
 0x39f   : > { %1316 = vpow2.f32 %v847_v41  ;;  %776 = vadd.xlane.f32.xlu0 %v775_v43  ;;  %v699_v44 = vsel %vm625_vm1, %v1315_v42, 0.0 }
 0x3a0   : > { %700 = vadd.xlane.f32.xlu2 %v699_v44 }
 0x3a5   : > { %v1317_v45 = vpop.eup %1316 }
 0x3a6   : > { %v849_v46 = vsel %vm625_vm1, %v1317_v45, 0.0 }
 0x3a7   : > { %850 = vadd.xlane.f32.xlu0 %v849_v46 }
 0x3ab   : > { %v1293_v47 = vpop.permute.xlu1 %1292 }
 0x3ac   : > { %v1294_v48 = vunpack.i.l.bf16 %v1293_v47  ;;  %v1295_v49 = vunpack.i.h.bf16 %v1293_v47 }
 0x3ae   : > { %729 = vmatpush.msrb.mxu3 %v1294_v48 }
 0x3b0   : > { %730 = vmatpush.msrb.mxu3 %v1295_v49 }
 0x3b8   : > { %1297 = vrot.lane.b32.xlu2 %v1291_v31, %s1629_s11 }
 0x3bb   : > { %1302 = vrot.lane.b32.xlu0 %v1291_v31, %s1630_s22 }
 0x412   : > { %v777_v50 = vpop.xlane.xlu0 %776 }
 0x413   : > { %v701_v51 = vpop.xlane.xlu2 %700 }
 0x414   : > { %1318 = vrcp.f32 %v701_v51 }
 0x415   : > { %1320 = vrcp.f32 %v777_v50 }
 0x41a   : > { %v1319_v52 = vpop.eup %1318  ;;  %v851_v53 = vpop.xlane.xlu0 %850 }
 0x41b   : > { %v703_v54 = vmul.f32 %v1319_v52, %v1315_v42  ;;  %1322 = vrcp.f32 %v851_v53  ;;  %v1298_v55 = vpop.permute.xlu2 %1297  ;;  %v1321_v57 = vpop.eup %1320 }
 0x41c   : > { %v1299_v56 = vunpack.i.l.bf16 %v1298_v55  ;;  %v1300_v59 = vunpack.i.h.bf16 %v1298_v55  ;;  %v779_v60 = vmul.f32 %v1321_v57, %v1313_v40 }
 0x41d   : > { %1171 = vmatmul.msk.f32.vlgmr.msrb.gmra.mxu3 %vm625_vm1, %v703_v54  ;;  %v735_v58 = vadd.f32 %v703_v54, %v1887_v15  ;;  %v909_v15 = vld [vmem:[#allocation11 + $0x40] sm:$0xff] }
 0x41e   : > { %803 = vmatpush.msra.mxu3 %v1299_v56  ;;  %928 = vmatpush.msrb.mxu2 %v909_v15 }
 0x41f   : > { %v809_v62 = vadd.f32 %v779_v60, %v735_v58 }
 0x420   : > { %804 = vmatpush.msra.mxu3 %v1300_v59  ;;  %929 = vmatpush.msrb.mxu2 %v908_v16 }
 0x421   : > { %v1323_v61 = vpop.eup %1322 }
 0x422   : > { %v853_v63 = vmul.f32 %v1323_v61, %v1317_v45  ;;  %930 = vmatpush.msrb.mxu2 %v907_v17 }
 0x424   : > { %v883_v0 = vadd.f32 %v853_v63, %v809_v62  ;;  %931 = vmatpush.msrb.mxu2 %v906_v18 }
 0x425   : > { %1175 = vmatmul.msk.f32.vlgmr.msra.gmra.mxu3 %vm625_vm1, %v779_v60 }
 0x426   : > { %v942_v1 = vmul.f32 0.25, %v883_v0  ;;  %932 = vmatpush.msrb.mxu2 %v905_v19 }
 0x428   : > { %943 = vst.msk [vmem:[%s466_s6] sm:$0xff] %vm625_vm1, %v942_v1  ;;  %933 = vmatpush.msrb.mxu2 %v904_v20 }
 0x42a   : > { %934 = vmatpush.msrb.mxu2 %v903_v22 }
 0x42c   : > { %935 = vmatpush.msrb.mxu2 %v902_v23 }
 0x42d   : > { %v1303_v2 = vpop.permute.xlu0 %1302 }
 0x42e   : > { %v1304_v3 = vunpack.i.l.bf16 %v1303_v2  ;;  %v1305_v4 = vunpack.i.h.bf16 %v1303_v2  ;;  %936 = vmatpush.msrb.mxu2 %v901_v24 }
 0x430   : > { %877 = vmatpush.msrb.mxu1 %v1304_v3 }
 0x432   : > { %878 = vmatpush.msrb.mxu1 %v1305_v4 }
 0x433   : > { %1179 = vmatmul.msk.f32.vlgmr.msrb.gmra.mxu1 %vm625_vm1, %v853_v63 }
 0x4a0   : > { %v732_v5 = vpop.f32.mrf.mxu3 }
 0x4a1   : > { %885 = vrot.lane.b32.xlu1 %v732_v5, %s1630_s22 }
 0x4a8   : > { %v806_v6 = vpop.f32.mrf.mxu3 }
 0x4a9   : > { %889 = vrot.lane.b32.xlu2 %v806_v6, %s1629_s11 }
 0x4b0   : > { %v880_v7 = vpop.f32.mrf.mxu1 }
 0x4b1   : > { %893 = vrot.lane.b32.xlu1 %v880_v7, %s1628_s20 }
 0x503   : > { %v890_v27 = vpop.permute.xlu2 %889 }
 0x513   : > { %v886_v25 = vpop.permute.xlu1 %885 }
 0x514   : > { %v896_v26 = vsel %vm594_vm0, %v1897_v21, %v886_v25 }
 0x515   : > { %v898_v29 = vsel %vm897_vm2, %v896_v26, %v890_v27 }
 0x523   : > { %v894_v28 = vpop.permute.xlu1 %893 }
 0x524   : > { %v900_v30 = vsel %vm899_vm3, %v898_v29, %v894_v28 }
 0x525   : > { %937 = vmatmul.f32.vlgmr.msrb.gmra.mxu2 %v900_v30 }
 0x526   : > { %1531 = shalt.err (!%p1528_p8)
}
 0x527   : > { %1208 = dma.vmem_to_hbm [thread:$0]  (%p1776_p4), %s977_s4, 128, %s979_s28, %s950_s26   ;;  %v1307_v21 = vld [vmem:[%s1981_s7] ss:$0 sm:$0xff] }
 0x528   : > { %s960_s11 = scalar_lea.hbm %s1982_s8, %s1182_s3  ;;  %s459_s29 = scalar_lea.vmem [#allocation13], %s1835_s21 }
 0x529   : > { %s962_s13 = sshll.u32 %s459_s29, 4  ;;  %s964_s25 = sshll.u32 %s960_s11, 4  ;;  %s963_s13 = int_to_ptr.vmem [resolvable:$true] %s962_s13  ;;  %s965_s25 = int_to_ptr.hbm [resolvable:$true] %s964_s25 }
 0x52a   : > { %s945_s23 = scalar_lea.sflag [#allocation4], %s1832_s14  ;;  %s1546_s2 = sshra.s32 %s965_s25, 4  ;;  %s1547_s2 = int_to_ptr.hbm [resolvable:$true] %s1546_s2 }
 0x52b   : > { %s1548_s4 = scalar_lea.hbm %s1547_s2, 8  ;;  %s1552_s26 = scalar_lea.hbm %s1982_s8, 16 }
 0x52c   : > { %p1549_p10 = scmp.ne.s32.totalorder %s1547_s2, %s1548_s4  ;;  %p1553_p0 = scmp.lt.s32.totalorder %s1547_s2, %s1982_s8 }
 0x52d   : > { %p1554_p2 = scmp.lt.s32.totalorder %s1552_s26, %s1548_s4 }
 0x52e   : > { %p1550_p13 = pnand %p1549_p10, %p1776_p4 }
 0x52f   : > { %p1555_p1 = por %p1554_p2, %p1553_p0 }
 0x530   : > { %p1551_p11 = pneg %p1550_p13 }
 0x532   : > { %p1556_p3 = pnand %p1555_p1, %p1551_p11 }
 0x5a8   : > { %v938_v31 = vpop.f32.mrf.mxu2 }
 0x5a9   : > { %v939_v32 = vadd.f32 %v1307_v21, %v938_v31 }
 0x5ab   : > { %941 = vst [vmem:[%s459_s29] sm:$0xff] %v939_v32 }
 0x5ac   : > { %1559 = shalt.err (!%p1556_p3)
}
 0x5ad   : > { %1207 = dma.vmem_to_hbm [thread:$0]  (%p1776_p4), %s963_s13, 128, %s965_s25, %s945_s23  }
 0x5ae PF: > { %s990_s15 = sand.u32 1, %s1606_s30   ;;  %p2012_p12 = scmp.ge.s32.totalorder %s1618_s12, 2 }
 0x5af   : > { %s991_s16 = scalar_lea.sflag [#allocation4], %s990_s15 }
 0x5b0   : > { %p1232_p7 = pnand %p2012_p12, %p1780_p6 }
 0x5b2   : > { %p1233_p9 = pneg %p1232_p7 }
 0x5b4   : > { %1597 = dma.done.wait (%p1233_p9), %s991_s16, 128  }
 0x5b5   : > { %1599 = vsyncadd (%p1233_p9), %s991_s16, 4294967168  ;;  %s1001_s27 = scalar_lea.sflag [#allocation15], %s990_s15 }
 0x5b6   : > { %1601 = dma.done.wait (%p1233_p9), %s1001_s27, 128  }
 0x5b7   : > { %1603 = vsyncadd (%p1233_p9), %s1001_s27, 4294967168  ;;  %s2013_s12 = sld [smem:[#allocation24_spill]]  ;;  %s2016_s30 = smov %s1610_s10 }
 0x5b8   : > { %s2014_s20 = sld [smem:[#allocation23_spill]] }
 0x5b9   : > { %s2015_s11 = sld [smem:[#allocation25_spill]] }
 0x5bd   : > { %p31_p4 = scmp.ge.s32.totalorder %s2013_s12, 4  }
 0x5be   : > { %s2017_s10 = smov %s2014_s20 }
 0x5bf   :  { %33 = sbr.rel (!%p31_p4) target bundleno = 16 (0x10), region = 143 }
 0x5c4   :  { %1007 = vsyncpa [#allocation3], 1 }
 0x5c5   :  { %1009 = vsyncpa [#allocation3 + $0x1], 1 }
 0x5c6   :  { %1010 = vsyncpa [#allocation6], 1 }
 0x5c7   :  { %1012 = vsyncpa [#allocation6 + $0x1], 1 }
 0x5c8   :  { %1013 = vsyncpa [#allocation9], 1 }
 0x5c9   :  { %1014 = vsyncpa [#allocation12], 1 }
 0x5ca   :  { %1015 = vsyncpa [#allocation4], 1 }
 0x5cb   :  { %1017 = vsyncpa [#allocation4 + $0x1], 1 }
 0x5cc   :  { %1018 = vsyncpa [#allocation15], 1 }
 0x5cd   :  { %1020 = vsyncpa [#allocation15 + $0x1], 1 }

</bundles_post_ra>
